<compile_context>
chip_gen: v6e
topology: v6e:2x2x1
jax: 0.10.0
libtpu: 0.0.40
codegen_flags: <defaults>
</compile_context>

<pallas_src>
import functools

import jax
import jax.numpy as jnp
from jax.experimental import pallas as pl
from jax.experimental.pallas import tpu as pltpu


def _round_up(x, m):
    return ((x + m - 1) // m) * m


def _biaffine_kernel(x1_ref, x2_ref, wbil_ref, sel_ref, wlin1_ref, wlin2_ref,
                     b_ref, o_ref):
    """One batch tile.

    x1_ref, x2_ref : (TB, D)      input tiles
    wbil_ref       : (D, O*D)     bilinear weight, wbil_ref[i, o*D + j] = W[o, i, j]
    sel_ref        : (O*D, O)     0/1 grouped-reduction matrix (sel[o*D + j, o] = 1)
    wlin1_ref      : (D, O)       linear weight acting on x1 (already transposed)
    wlin2_ref      : (D, O)       linear weight acting on x2 (already transposed)
    b_ref          : (1, O)       linear bias
    o_ref          : (TB, O)      output tile
    """
    x1 = x1_ref[...]
    x2 = x2_ref[...]
    num_out = o_ref.shape[-1]

    # ---- Bilinear term: a single fused MXU matmul over all output channels. ----
    # t[:, o*D + j] = (x1 @ W[o])[:, j]
    t = jnp.dot(x1, wbil_ref[...], preferred_element_type=jnp.float32)        # (TB, O*D)
    # Lane-replicate x2 O times so column o*D + j holds x2[:, j].
    x2f = x2.astype(jnp.float32)
    x2_rep = jnp.concatenate([x2f] * num_out, axis=-1)                        # (TB, O*D)
    # Grouped lane reduction (sum each D-wide block) as a tiny 0/1 matmul.
    bil = jnp.dot(t * x2_rep, sel_ref[...],
                  preferred_element_type=jnp.float32)                         # (TB, O)

    # ---- Linear term on concat(x1, x2): two matmuls, no concat needed. ----
    lin = (jnp.dot(x1, wlin1_ref[...], preferred_element_type=jnp.float32)
           + jnp.dot(x2, wlin2_ref[...], preferred_element_type=jnp.float32)
           + b_ref[...])                                                      # (TB, O)

    o_ref[...] = (bil + lin).astype(o_ref.dtype)


@functools.partial(jax.jit, static_argnames=("tb",))
def biaffine_attention(x1, x2, w_bil, w_lin, b_lin, *, tb=256):
    """x1, x2: (N, D);  w_bil: (O, D, D);  w_lin: (O, 2D);  b_lin: (O,)  ->  (N, O)."""
    n, d = x1.shape
    o = w_bil.shape[0]

    # Batch tile: big (MXU-filling) but never larger than needed; ragged N is handled
    # by padding to a tile multiple and slicing the result afterwards.
    tb = max(8, min(_round_up(tb, 8), _round_up(n, 8)))
    n_pad = _round_up(n, tb)
    if n_pad != n:
        x1 = jnp.pad(x1, ((0, n_pad - n), (0, 0)))
        x2 = jnp.pad(x2, ((0, n_pad - n), (0, 0)))

    # --- Parameter preprocessing (plain JAX glue, runs once under jit). ---
    # W[o, i, j] -> wbil_flat[i, o*D + j]  (so the bilinear term is one matmul).
    w_bil_flat = jnp.transpose(w_bil, (1, 0, 2)).reshape(d, o * d)
    # Grouped-reduction selector: sel[o*D + j, o'] = 1 iff o == o'.
    sel = jnp.repeat(jnp.eye(o, dtype=jnp.float32), d, axis=0)                # (O*D, O)
    w_lin1 = jnp.transpose(w_lin[:, :d])                                      # (D, O)
    w_lin2 = jnp.transpose(w_lin[:, d:])                                      # (D, O)
    b2 = b_lin.reshape(1, o).astype(jnp.float32)

    # --- Explicit VMEM budget (weights single-buffered, x/out tiles double-buffered). ---
    isz = x1.dtype.itemsize
    vmem_needed = (
        2 * 2 * tb * d * isz                             # x1/x2 tiles, double-buffered
        + (d * o * d) * w_bil_flat.dtype.itemsize        # bilinear weight, single buffer
        + (o * d * o + 2 * d * o + o) * 4                # selector / linear weights / bias
        + 2 * tb * o * isz                               # output tile, double-buffered
    )
    vmem_limit = min(max(int(1.5 * vmem_needed) + (4 << 20), 32 << 20), 128 << 20)

    grid = (n_pad // tb,)
    out = pl.pallas_call(
        _biaffine_kernel,
        out_shape=jax.ShapeDtypeStruct((n_pad, o), x1.dtype),
        grid_spec=pltpu.PrefetchScalarGridSpec(
            num_scalar_prefetch=0,
            grid=grid,
            in_specs=[
                pl.BlockSpec((tb, d), lambda i: (i, 0)),         # x1 tile
                pl.BlockSpec((tb, d), lambda i: (i, 0)),         # x2 tile
                # Constant operands: single-buffered (no 2x VMEM, no re-DMA per step).
                pl.BlockSpec((d, o * d), lambda i: (0, 0),
                             pipeline_mode=pl.Buffered(1)),      # bilinear weight (flat)
                pl.BlockSpec((o * d, o), lambda i: (0, 0),
                             pipeline_mode=pl.Buffered(1)),      # selection matrix
                pl.BlockSpec((d, o), lambda i: (0, 0),
                             pipeline_mode=pl.Buffered(1)),      # linear weight, x1 half
                pl.BlockSpec((d, o), lambda i: (0, 0),
                             pipeline_mode=pl.Buffered(1)),      # linear weight, x2 half
                pl.BlockSpec((1, o), lambda i: (0, 0),
                             pipeline_mode=pl.Buffered(1)),      # bias
            ],
            out_specs=pl.BlockSpec((tb, o), lambda i: (i, 0)),
        ),
        compiler_params=pltpu.CompilerParams(
            dimension_semantics=("parallel",),   # batch axis can shard across TCs (v7x)
            vmem_limit_bytes=vmem_limit,
        ),
    )(x1, x2, w_bil_flat, sel, w_lin1, w_lin2, b2)

    return out[:n]


def _reference(x1, x2, w_bil, w_lin, b_lin):
    bil = jnp.einsum("ni,oij,nj->no", x1, w_bil, x2)
    lin = jnp.concatenate([x1, x2], axis=-1) @ w_lin.T + b_lin
    return bil + lin


if __name__ == "__main__":
    # Ragged batch (not a multiple of 8) exercises the pad/slice path.
    batch, in_features, out_features = 50, 32, 4

    key = jax.random.PRNGKey(0)
    k1, k2, k3, k4, k5 = jax.random.split(key, 5)

    x1 = jax.random.normal(k1, (batch, in_features), dtype=jnp.float32)
    x2 = jax.random.normal(k2, (batch, in_features), dtype=jnp.float32)

    # Deterministic synthetic parameters (same shapes as torch.nn.Bilinear / Linear).
    bound_bil = 1.0 / (in_features ** 0.5)
    w_bil = jax.random.uniform(k3, (out_features, in_features, in_features),
                               minval=-bound_bil, maxval=bound_bil, dtype=jnp.float32)
    bound_lin = 1.0 / ((2 * in_features) ** 0.5)
    w_lin = jax.random.uniform(k4, (out_features, 2 * in_features),
                               minval=-bound_lin, maxval=bound_lin, dtype=jnp.float32)
    b_lin = jax.random.uniform(k5, (out_features,),
                               minval=-bound_lin, maxval=bound_lin, dtype=jnp.float32)

    out = biaffine_attention(x1, x2, w_bil, w_lin, b_lin)
    out = jax.block_until_ready(out)

    ref = _reference(x1, x2, w_bil, w_lin, b_lin)
    assert out.shape == (batch, out_features)
    assert jnp.allclose(out, ref, atol=1e-4, rtol=1e-4), "mismatch vs reference"

    print("KERNEL_OK")
</pallas_src>

<mosaic_0001>
module attributes {stable_mosaic.version = 11 : i64} {
  func.func @_biaffine_kernel(%arg0: i32, %arg1: memref<56x32xf32, #tpu.memory_space<vmem>>, %arg2: memref<56x32xf32, #tpu.memory_space<vmem>>, %arg3: memref<32x128xf32, #tpu.memory_space<vmem>>, %arg4: memref<128x4xf32, #tpu.memory_space<vmem>>, %arg5: memref<32x4xf32, #tpu.memory_space<vmem>>, %arg6: memref<32x4xf32, #tpu.memory_space<vmem>>, %arg7: memref<1x4xf32, #tpu.memory_space<vmem>>, %arg8: memref<56x4xf32, #tpu.memory_space<vmem>>) attributes {dimension_semantics = [#tpu.dimension_semantics<parallel>], iteration_bounds = array<i64: 1>, scalar_prefetch = 0 : i64, scratch_operands = 0 : i64, tpu.core_type = #tpu.core_type<tc>, window_params = [{transform_indices = @transform_0, window_bounds = array<i64: 56, 32>}, {transform_indices = @transform_1, window_bounds = array<i64: 56, 32>}, {pipeline_mode = #tpu.pipeline_mode<synchronous>, transform_indices = @transform_2, window_bounds = array<i64: 32, 128>}, {pipeline_mode = #tpu.pipeline_mode<synchronous>, transform_indices = @transform_3, window_bounds = array<i64: 128, 4>}, {pipeline_mode = #tpu.pipeline_mode<synchronous>, transform_indices = @transform_4, window_bounds = array<i64: 32, 4>}, {pipeline_mode = #tpu.pipeline_mode<synchronous>, transform_indices = @transform_5, window_bounds = array<i64: 32, 4>}, {pipeline_mode = #tpu.pipeline_mode<synchronous>, transform_indices = @transform_6, window_bounds = array<i64: 1, 4>}, {transform_indices = @transform_7, window_bounds = array<i64: 56, 4>}]} {
    %c0 = arith.constant 0 : index
    %c0_0 = arith.constant 0 : index
    %0 = vector.load %arg1[%c0, %c0_0] : memref<56x32xf32, #tpu.memory_space<vmem>>, vector<56x32xf32>
    %c0_1 = arith.constant 0 : index
    %c0_2 = arith.constant 0 : index
    %1 = vector.load %arg2[%c0_1, %c0_2] : memref<56x32xf32, #tpu.memory_space<vmem>>, vector<56x32xf32>
    %c0_3 = arith.constant 0 : index
    %c0_4 = arith.constant 0 : index
    %2 = vector.load %arg3[%c0_3, %c0_4] : memref<32x128xf32, #tpu.memory_space<vmem>>, vector<32x128xf32>
    %cst = arith.constant dense<0.000000e+00> : vector<56x128xf32>
    %3 = tpu.matmul %0, %2, %cst {dimension_numbers = #tpu.dot_dimension_numbers<[1], [0], [0], [1], [0, 0, 1, 1], [], []>} : vector<56x32xf32>, vector<32x128xf32>, vector<56x128xf32> -> vector<56x128xf32>
    %4 = tpu.concatenate %1, %1, %1, %1 in 1 : vector<56x32xf32>, vector<56x32xf32>, vector<56x32xf32>, vector<56x32xf32> -> vector<56x128xf32>
    %5 = arith.mulf %3, %4 : vector<56x128xf32>
    %c0_5 = arith.constant 0 : index
    %c0_6 = arith.constant 0 : index
    %6 = vector.load %arg4[%c0_5, %c0_6] : memref<128x4xf32, #tpu.memory_space<vmem>>, vector<128x4xf32>
    %cst_7 = arith.constant dense<0.000000e+00> : vector<56x4xf32>
    %7 = tpu.matmul %5, %6, %cst_7 {dimension_numbers = #tpu.dot_dimension_numbers<[1], [0], [0], [1], [0, 0, 1, 1], [], []>} : vector<56x128xf32>, vector<128x4xf32>, vector<56x4xf32> -> vector<56x4xf32>
    %c0_8 = arith.constant 0 : index
    %c0_9 = arith.constant 0 : index
    %8 = vector.load %arg5[%c0_8, %c0_9] : memref<32x4xf32, #tpu.memory_space<vmem>>, vector<32x4xf32>
    %cst_10 = arith.constant dense<0.000000e+00> : vector<56x4xf32>
    %9 = tpu.matmul %0, %8, %cst_10 {dimension_numbers = #tpu.dot_dimension_numbers<[1], [0], [0], [1], [0, 0, 1, 1], [], []>} : vector<56x32xf32>, vector<32x4xf32>, vector<56x4xf32> -> vector<56x4xf32>
    %c0_11 = arith.constant 0 : index
    %c0_12 = arith.constant 0 : index
    %10 = vector.load %arg6[%c0_11, %c0_12] : memref<32x4xf32, #tpu.memory_space<vmem>>, vector<32x4xf32>
    %cst_13 = arith.constant dense<0.000000e+00> : vector<56x4xf32>
    %11 = tpu.matmul %1, %10, %cst_13 {dimension_numbers = #tpu.dot_dimension_numbers<[1], [0], [0], [1], [0, 0, 1, 1], [], []>} : vector<56x32xf32>, vector<32x4xf32>, vector<56x4xf32> -> vector<56x4xf32>
    %12 = arith.addf %9, %11 : vector<56x4xf32>
    %c0_14 = arith.constant 0 : index
    %c0_15 = arith.constant 0 : index
    %13 = vector.load %arg7[%c0_14, %c0_15] : memref<1x4xf32, #tpu.memory_space<vmem>>, vector<1x4xf32>
    %14 = vector.broadcast %13 : vector<1x4xf32> to vector<56x4xf32>
    %15 = arith.addf %12, %14 : vector<56x4xf32>
    %16 = arith.addf %7, %15 : vector<56x4xf32>
    %c0_16 = arith.constant 0 : index
    %c0_17 = arith.constant 0 : index
    %17 = vector.load %arg8[%c0_16, %c0_17] : memref<56x4xf32, #tpu.memory_space<vmem>>, vector<56x4xf32>
    tpu.vector_store %arg8[%c0_16, %c0_17], %16 {strides = array<i32>} : memref<56x4xf32, #tpu.memory_space<vmem>>, vector<56x4xf32>,
    return
  }
  func.func @transform_0(%arg0: i32) -> (i32, i32) {
    %c0_i32 = arith.constant 0 : i32
    %c0_i32_0 = arith.constant 0 : i32
    return %arg0, %c0_i32 : i32, i32
  }
  func.func @transform_1(%arg0: i32) -> (i32, i32) {
    %c0_i32 = arith.constant 0 : i32
    %c0_i32_0 = arith.constant 0 : i32
    return %arg0, %c0_i32 : i32, i32
  }
  func.func @transform_2(%arg0: i32) -> (i32, i32) {
    %c0_i32 = arith.constant 0 : i32
    %c0_i32_0 = arith.constant 0 : i32
    %c0_i32_1 = arith.constant 0 : i32
    return %c0_i32, %c0_i32_0 : i32, i32
  }
  func.func @transform_3(%arg0: i32) -> (i32, i32) {
    %c0_i32 = arith.constant 0 : i32
    %c0_i32_0 = arith.constant 0 : i32
    %c0_i32_1 = arith.constant 0 : i32
    return %c0_i32, %c0_i32_0 : i32, i32
  }
  func.func @transform_4(%arg0: i32) -> (i32, i32) {
    %c0_i32 = arith.constant 0 : i32
    %c0_i32_0 = arith.constant 0 : i32
    %c0_i32_1 = arith.constant 0 : i32
    return %c0_i32, %c0_i32_0 : i32, i32
  }
  func.func @transform_5(%arg0: i32) -> (i32, i32) {
    %c0_i32 = arith.constant 0 : i32
    %c0_i32_0 = arith.constant 0 : i32
    %c0_i32_1 = arith.constant 0 : i32
    return %c0_i32, %c0_i32_0 : i32, i32
  }
  func.func @transform_6(%arg0: i32) -> (i32, i32) {
    %c0_i32 = arith.constant 0 : i32
    %c0_i32_0 = arith.constant 0 : i32
    %c0_i32_1 = arith.constant 0 : i32
    return %c0_i32, %c0_i32_0 : i32, i32
  }
  func.func @transform_7(%arg0: i32) -> (i32, i32) {
    %c0_i32 = arith.constant 0 : i32
    %c0_i32_0 = arith.constant 0 : i32
    return %arg0, %c0_i32 : i32, i32
  }
}

</mosaic_0001>

<bundles_post_ra>
// kernel: biaffine_attention.1
= control target key start
LH: loop header
LB: loop body
LE: loop exit
PB: predicated region body
PF: predicated region fallthrough
CT: control target
= control target key end

     0   :  { %v853_v0 = vmov 0.0   ;;  %vm854_vm0 = vmmov 0   ;;  %s855_s11 = smov 32   ;;  %vm44_vm1 = vcmask 261120   ;;  %s856_s14 = smov 96   ;;  %vm243_vm2 = vcmask 523264   ;;  %s1279_s2 = inlined_call_operand.vmem [shape: f32[32,128], index: 2, kind: input, shape index: {}]   ;;  %s1280_s1 = inlined_call_operand.vmem [shape: f32[56,32], index: 1, kind: input, shape index: {}]   ;;  %s1281_s0 = inlined_call_operand.vmem [shape: f32[56,32], index: 0, kind: input, shape index: {}]   ;;  %s1282_s5 = inlined_call_operand.vmem [shape: f32[32,4], index: 5, kind: input, shape index: {}]   ;;  %s1283_s4 = inlined_call_operand.vmem [shape: f32[32,4], index: 4, kind: input, shape index: {}]   ;;  %s1284_s3 = inlined_call_operand.vmem [shape: f32[128,4], index: 3, kind: input, shape index: {}]   ;;  %s1285_s6 = inlined_call_operand.vmem [shape: f32[1,4], index: 6, kind: input, shape index: {}]   ;;  %s1286_s7 = inlined_call_operand.vmem [shape: f32[56,4], index: 7, kind: output, shape index: {}]  }
   0x1   :  { %708 = vmatprep.subr.mxu0 %v853_v0  ;;  %v43_v1 = vld [vmem:[%s1279_s2 + $0x18] sm:$0xff]  ;;  %v42_v2 = vld [vmem:[%s1279_s2 + $0x10] sm:$0xff]  ;;  %716 = vmatprep.mubr.msk.f32.mxu0 %vm854_vm0, %v853_v0  ;;  %v41_v3 = vld [vmem:[%s1279_s2 + $0x8] sm:$0xff]  ;;  %s857_s18 = smov 64   ;;  %vm251_vm3 = vcmask 785408   ;;  %vm618_vm4 = vcmask 31744  }
   0x2   :  { %709 = vmatpush3.msra.mxu0 %v43_v1  ;;  %737 = vmatprep.subr.mxu1 %v853_v0  ;;  %v917_v4 = vld [vmem:[%s1280_s1] sm:$0xff]  ;;  %v936_v7 = vld [vmem:[%s1280_s1 + $0x8] sm:$0xff]  ;;  %v289_v8 = vld [vmem:[%s1282_s5 + $0x18] sm:$0xff] }
   0x3   :  { %710 = vmatprep.subr.mxu0 %v853_v0  ;;  %745 = vmatprep.mubr.msk.f32.mxu1 %vm854_vm0, %v853_v0  ;;  %v40_v5 = vld [vmem:[%s1279_s2] sm:$0xff]  ;;  %v288_v9 = vld [vmem:[%s1282_s5 + $0x10] sm:$0xff]  ;;  %v285_v10 = vld [vmem:[%s1283_s4 + $0x18] sm:$0xff] }
   0x4   :  { %711 = vmatpush3.msra.mxu0 %v42_v2  ;;  %173 = vrot.lane.b32.xlu0 %v917_v4, %s855_s11  ;;  %v928_v6 = vld [vmem:[%s1281_s0] sm:$0xff]  ;;  %v956_v11 = vld [vmem:[%s1281_s0 + $0x8] sm:$0xff]  ;;  %v284_v13 = vld [vmem:[%s1283_s4 + $0x10] sm:$0xff] }
   0x5   :  { %712 = vmatprep.subr.mxu0 %v853_v0  ;;  %215 = vrot.lane.b32.xlu1 %v917_v4, %s856_s14  ;;  %v287_v12 = vld [vmem:[%s1282_s5 + $0x8] sm:$0xff]  ;;  %v977_v14 = vld [vmem:[%s1281_s0 + $0x10] sm:$0xff]  ;;  %v286_v16 = vld [vmem:[%s1282_s5] sm:$0xff] }
   0x6   :  { %713 = vmatpush3.msra.mxu0 %v41_v3  ;;  %738 = vmatpush3.msra.mxu1 %v289_v8  ;;  %v984_v15 = vld [vmem:[%s1280_s1 + $0x10] sm:$0xff]  ;;  %v283_v17 = vld [vmem:[%s1283_s4 + $0x8] sm:$0xff]  ;;  %v1003_v18 = vld [vmem:[%s1281_s0 + $0x18] sm:$0xff] }
   0x7   :  { %714 = vmatprep.subr.mxu0 %v853_v0  ;;  %739 = vmatprep.subr.mxu1 %v853_v0  ;;  %v1010_v19 = vld [vmem:[%s1280_s1 + $0x18] sm:$0xff]  ;;  %v282_v20 = vld [vmem:[%s1283_s4] sm:$0xff]  ;;  %v1046_v23 = vld [vmem:[%s1281_s0 + $0x28] sm:$0xff] }
   0x8   :  { %715 = vmatpush3.msra.mxu0 %v40_v5  ;;  %194 = vrot.lane.b32.xlu0 %v917_v4, %s857_s18  ;;  %v1026_v21 = vld [vmem:[%s1281_s0 + $0x20] sm:$0xff]  ;;  %v281_v22 = vld [vmem:[%s1284_s3 + $0x78] sm:$0xff]  ;;  %v280_v25 = vld [vmem:[%s1284_s3 + $0x70] sm:$0xff] }
   0x9   :  { %717 = vmatmul.mubr.msk.f32.vlgmr.msra.gmra.mxu0 %vm44_vm1, %v928_v6  ;;  %175 = vrot.lane.b32.xlu1 %v936_v7, %s855_s11  ;;  %v1053_v24 = vld [vmem:[%s1280_s1 + $0x20] sm:$0xff]  ;;  %v1072_v26 = vld [vmem:[%s1281_s0 + $0x30] sm:$0xff]  ;;  %v1079_v27 = vld [vmem:[%s1280_s1 + $0x28] sm:$0xff] }
   0xa   :  { %719 = vmatprep.mubr.msk.f32.mxu0 %vm854_vm0, %v853_v0  ;;  %766 = vmatprep.subr.mxu0 %v853_v0  ;;  %v279_v28 = vld [vmem:[%s1284_s3 + $0x68] sm:$0xff]  ;;  %v278_v29 = vld [vmem:[%s1284_s3 + $0x60] sm:$0xff]  ;;  %v1114_v30 = vld [vmem:[%s1280_s1 + $0x30] sm:$0xff] }
   0xb   :  { %740 = vmatpush3.msra.mxu1 %v288_v9  ;;  %767 = vmatpush3.msra.mxu0 %v285_v10  ;;  %v277_v31 = vld [vmem:[%s1284_s3 + $0x58] sm:$0xff]  ;;  %v276_v32 = vld [vmem:[%s1284_s3 + $0x50] sm:$0xff]  ;;  %v275_v33 = vld [vmem:[%s1284_s3 + $0x48] sm:$0xff] }
   0xc   :  { %196 = vrot.lane.b32.xlu0 %v936_v7, %s857_s18  ;;  %741 = vmatprep.subr.mxu1 %v853_v0  ;;  %v274_v34 = vld [vmem:[%s1284_s3 + $0x40] sm:$0xff]  ;;  %v273_v35 = vld [vmem:[%s1284_s3 + $0x38] sm:$0xff]  ;;  %v272_v36 = vld [vmem:[%s1284_s3 + $0x30] sm:$0xff] }
   0xd   :  { %720 = vmatmul.mubr.msk.f32.gmra.mxu0 %vm44_vm1, %v956_v11  ;;  %217 = vrot.lane.b32.xlu1 %v936_v7, %s856_s14  ;;  %v271_v37 = vld [vmem:[%s1284_s3 + $0x28] sm:$0xff]  ;;  %v270_v38 = vld [vmem:[%s1284_s3 + $0x20] sm:$0xff]  ;;  %v269_v39 = vld [vmem:[%s1284_s3 + $0x18] sm:$0xff] }
   0xe   :  { %722 = vmatprep.mubr.msk.f32.mxu0 %vm854_vm0, %v853_v0  ;;  %768 = vmatprep.subr.mxu0 %v853_v0  ;;  %v268_v40 = vld [vmem:[%s1284_s3 + $0x10] sm:$0xff]  ;;  %v267_v41 = vld [vmem:[%s1284_s3 + $0x8] sm:$0xff]  ;;  %v266_v42 = vld [vmem:[%s1284_s3] sm:$0xff] }
   0xf   :  { %742 = vmatpush3.msra.mxu1 %v287_v12  ;;  %769 = vmatpush3.msra.mxu0 %v284_v13 }
  0x10   :  { %177 = vrot.lane.b32.xlu0 %v984_v15, %s855_s11  ;;  %743 = vmatprep.subr.mxu1 %v853_v0 }
  0x11   :  { %723 = vmatmul.mubr.msk.f32.gmra.mxu0 %vm44_vm1, %v977_v14  ;;  %198 = vrot.lane.b32.xlu1 %v984_v15, %s857_s18 }
  0x12   :  { %725 = vmatprep.mubr.msk.f32.mxu0 %vm854_vm0, %v853_v0  ;;  %770 = vmatprep.subr.mxu0 %v853_v0 }
  0x13   :  { %744 = vmatpush3.msra.mxu1 %v286_v16  ;;  %771 = vmatpush3.msra.mxu0 %v283_v17 }
  0x14   :  { %219 = vrot.lane.b32.xlu0 %v984_v15, %s856_s14  ;;  %746 = vmatmul.mubr.msk.f32.vlgmr.msra.gmra.mxu1 %vm44_vm1, %v917_v4 }
  0x15   :  { %726 = vmatmul.mubr.msk.f32.gmra.mxu0 %vm44_vm1, %v1003_v18  ;;  %179 = vrot.lane.b32.xlu1 %v1010_v19, %s855_s11 }
  0x16   :  { %728 = vmatprep.mubr.msk.f32.mxu0 %vm854_vm0, %v853_v0  ;;  %772 = vmatprep.subr.mxu0 %v853_v0 }
  0x17   :  { %773 = vmatpush3.msra.mxu0 %v282_v20  ;;  %795 = vmatprep.subr.mxu1 %v853_v0 }
  0x18   :  { %200 = vrot.lane.b32.xlu0 %v1010_v19, %s857_s18  ;;  %796 = vmatpush3.msra.mxu1 %v281_v22 }
  0x19   :  { %729 = vmatmul.mubr.msk.f32.gmra.mxu0 %vm44_vm1, %v1026_v21  ;;  %221 = vrot.lane.b32.xlu1 %v1010_v19, %s856_s14 }
  0x1a   :  { %731 = vmatprep.mubr.msk.f32.mxu0 %vm854_vm0, %v853_v0  ;;  %748 = vmatprep.mubr.msk.f32.mxu1 %vm854_vm0, %v853_v0 }
  0x1b   :  { %797 = vmatprep.subr.mxu1 %v853_v0  ;;  %749 = vmatmul.mubr.msk.f32.gmra.mxu1 %vm44_vm1, %v936_v7 }
  0x1c   :  { %181 = vrot.lane.b32.xlu0 %v1053_v24, %s855_s11  ;;  %798 = vmatpush3.msra.mxu1 %v280_v25 }
  0x1d   :  { %732 = vmatmul.mubr.msk.f32.gmra.mxu0 %vm44_vm1, %v1046_v23  ;;  %202 = vrot.lane.b32.xlu1 %v1053_v24, %s857_s18 }
  0x1e   :  { %734 = vmatprep.mubr.msk.f32.mxu0 %vm854_vm0, %v853_v0  ;;  %751 = vmatprep.mubr.msk.f32.mxu1 %vm854_vm0, %v853_v0 }
  0x1f   :  { %799 = vmatprep.subr.mxu1 %v853_v0  ;;  %752 = vmatmul.mubr.msk.f32.gmra.mxu1 %vm44_vm1, %v984_v15 }
  0x20   :  { %223 = vrot.lane.b32.xlu0 %v1053_v24, %s856_s14  ;;  %800 = vmatpush3.msra.mxu1 %v279_v28 }
  0x21   :  { %735 = vmatmul.mubr.msk.f32.gmra.mxu0 %vm44_vm1, %v1072_v26  ;;  %183 = vrot.lane.b32.xlu1 %v1079_v27, %s855_s11 }
  0x22   :  { %774 = vmatprep.mubr.msk.f32.mxu0 %vm854_vm0, %v853_v0  ;;  %754 = vmatprep.mubr.msk.f32.mxu1 %vm854_vm0, %v853_v0 }
  0x23   :  { %801 = vmatprep.subr.mxu1 %v853_v0  ;;  %755 = vmatmul.mubr.msk.f32.gmra.mxu1 %vm44_vm1, %v1010_v19 }
  0x24   :  { %204 = vrot.lane.b32.xlu0 %v1079_v27, %s857_s18  ;;  %802 = vmatpush3.msra.mxu1 %v278_v29 }
  0x25   :  { %775 = vmatmul.mubr.msk.f32.vlgmr.msra.gmra.mxu0 %vm44_vm1, %v928_v6  ;;  %225 = vrot.lane.b32.xlu1 %v1079_v27, %s856_s14 }
  0x26   :  { %777 = vmatprep.mubr.msk.f32.mxu0 %vm854_vm0, %v853_v0  ;;  %757 = vmatprep.mubr.msk.f32.mxu1 %vm854_vm0, %v853_v0 }
  0x27   :  { %803 = vmatprep.subr.mxu1 %v853_v0  ;;  %758 = vmatmul.mubr.msk.f32.gmra.mxu1 %vm44_vm1, %v1053_v24 }
  0x28   :  { %185 = vrot.lane.b32.xlu0 %v1114_v30, %s855_s11  ;;  %804 = vmatpush3.msra.mxu1 %v277_v31 }
  0x29   :  { %778 = vmatmul.mubr.msk.f32.gmra.mxu0 %vm44_vm1, %v956_v11  ;;  %206 = vrot.lane.b32.xlu1 %v1114_v30, %s857_s18 }
  0x2a   :  { %805 = vmatprep.subr.mxu1 %v853_v0  ;;  %780 = vmatprep.mubr.msk.f32.mxu0 %vm854_vm0, %v853_v0 }
  0x2b   :  { %806 = vmatpush3.msra.mxu1 %v276_v32  ;;  %760 = vmatprep.mubr.msk.f32.mxu1 %vm854_vm0, %v853_v0 }
  0x2c   :  { %227 = vrot.lane.b32.xlu0 %v1114_v30, %s856_s14  ;;  %807 = vmatprep.subr.mxu1 %v853_v0 }
  0x2d   :  { %781 = vmatmul.mubr.msk.f32.gmra.mxu0 %vm44_vm1, %v977_v14  ;;  %808 = vmatpush3.msra.mxu1 %v275_v33 }
  0x2e   :  { %783 = vmatprep.mubr.msk.f32.mxu0 %vm854_vm0, %v853_v0  ;;  %809 = vmatprep.subr.mxu1 %v853_v0 }
  0x2f   :  { %761 = vmatmul.mubr.msk.f32.gmra.mxu1 %vm44_vm1, %v1079_v27 }
  0x30   :  { %810 = vmatpush3.msra.mxu1 %v274_v34  ;;  %763 = vmatprep.mubr.msk.f32.mxu1 %vm854_vm0, %v853_v0 }
  0x31   :  { %784 = vmatmul.mubr.msk.f32.gmra.mxu0 %vm44_vm1, %v1003_v18  ;;  %811 = vmatprep.subr.mxu1 %v853_v0 }
  0x32   :  { %786 = vmatprep.mubr.msk.f32.mxu0 %vm854_vm0, %v853_v0  ;;  %812 = vmatpush3.msra.mxu1 %v273_v35 }
  0x33   :  { %813 = vmatprep.subr.mxu1 %v853_v0  ;;  %764 = vmatmul.mubr.msk.f32.gmra.mxu1 %vm44_vm1, %v1114_v30 }
  0x34   :  { %814 = vmatpush3.msra.mxu1 %v272_v36  ;;  %827 = vmatprep.mubr.msk.f32.mxu1 %vm854_vm0, %v853_v0 }
  0x35   :  { %787 = vmatmul.mubr.msk.f32.gmra.mxu0 %vm44_vm1, %v1026_v21  ;;  %815 = vmatprep.subr.mxu1 %v853_v0 }
  0x36   :  { %789 = vmatprep.mubr.msk.f32.mxu0 %vm854_vm0, %v853_v0  ;;  %816 = vmatpush3.msra.mxu1 %v271_v37 }
  0x37   :  { %817 = vmatprep.subr.mxu1 %v853_v0 }
  0x38   :  { %818 = vmatpush3.msra.mxu1 %v270_v38 }
  0x39   :  { %790 = vmatmul.mubr.msk.f32.gmra.mxu0 %vm44_vm1, %v1046_v23  ;;  %819 = vmatprep.subr.mxu1 %v853_v0 }
  0x3a   :  { %792 = vmatprep.mubr.msk.f32.mxu0 %vm854_vm0, %v853_v0  ;;  %820 = vmatpush3.msra.mxu1 %v269_v39 }
  0x3b   :  { %821 = vmatprep.subr.mxu1 %v853_v0 }
  0x3c   :  { %822 = vmatpush3.msra.mxu1 %v268_v40 }
  0x3d   :  { %793 = vmatmul.mubr.msk.f32.gmra.mxu0 %vm44_vm1, %v1072_v26  ;;  %823 = vmatprep.subr.mxu1 %v853_v0 }
  0x3e   :  { %824 = vmatpush3.msra.mxu1 %v267_v41 }
  0x3f   :  { %825 = vmatprep.subr.mxu1 %v853_v0 }
  0x40   :  { %826 = vmatpush3.msra.mxu1 %v266_v42 }
  0x76   :  { %v174_v43 = vpop.permute.xlu0 %173 }
  0x77   :  { %v216_v44 = vpop.permute.xlu1 %215  ;;  %v236_v54 = vsel %vm44_vm1, %v917_v4, %v174_v43 }
  0x7a   :  { %v195_v45 = vpop.permute.xlu0 %194 }
  0x7b   :  { %v176_v46 = vpop.permute.xlu1 %175  ;;  %v244_v56 = vsel %vm243_vm2, %v236_v54, %v195_v45 }
  0x7c   :  { %v237_v58 = vsel %vm44_vm1, %v936_v7, %v176_v46  ;;  %v252_v60 = vsel %vm251_vm3, %v244_v56, %v216_v44 }
  0x7e   :  { %v197_v47 = vpop.permute.xlu0 %196 }
  0x7f   :  { %v218_v48 = vpop.permute.xlu1 %217  ;;  %v245_v62 = vsel %vm243_vm2, %v237_v58, %v197_v47 }
  0x80   :  { %v253_v5 = vsel %vm251_vm3, %v245_v62, %v218_v48 }
  0x82   :  { %v178_v49 = vpop.permute.xlu0 %177 }
  0x83   :  { %v199_v50 = vpop.permute.xlu1 %198  ;;  %v238_v1 = vsel %vm44_vm1, %v984_v15, %v178_v49 }
  0x84   :  { %v246_v6 = vsel %vm243_vm2, %v238_v1, %v199_v50 }
  0x86   :  { %v220_v51 = vpop.permute.xlu0 %219 }
  0x87   :  { %v180_v52 = vpop.permute.xlu1 %179  ;;  %v254_v12 = vsel %vm251_vm3, %v246_v6, %v220_v51 }
  0x88   :  { %v239_v8 = vsel %vm44_vm1, %v1010_v19, %v180_v52 }
  0x8a   :  { %v201_v53 = vpop.permute.xlu0 %200 }
  0x8b   :  { %v222_v55 = vpop.permute.xlu1 %221  ;;  %v247_v13 = vsel %vm243_vm2, %v239_v8, %v201_v53 }
  0x8c   :  { %v255_v19 = vsel %vm251_vm3, %v247_v13, %v222_v55 }
  0x8e   :  { %v182_v57 = vpop.permute.xlu0 %181 }
  0x8f   :  { %v203_v61 = vpop.permute.xlu1 %202  ;;  %v240_v16 = vsel %vm44_vm1, %v1053_v24, %v182_v57 }
  0x90   :  { %v248_v21 = vsel %vm243_vm2, %v240_v16, %v203_v61 }
  0x92   :  { %v224_v3 = vpop.permute.xlu0 %223 }
  0x93   :  { %v184_v10 = vpop.permute.xlu1 %183  ;;  %v256_v29 = vsel %vm251_vm3, %v248_v21, %v224_v3 }
  0x94   :  { %v241_v23 = vsel %vm44_vm1, %v1079_v27, %v184_v10 }
  0x96   :  { %v205_v15 = vpop.permute.xlu0 %204 }
  0x97   :  { %v226_v20 = vpop.permute.xlu1 %225  ;;  %v249_v32 = vsel %vm243_vm2, %v241_v23, %v205_v15 }
  0x98   :  { %v257_v38 = vsel %vm251_vm3, %v249_v32, %v226_v20 }
  0x9a   :  { %v186_v28 = vpop.permute.xlu0 %185 }
  0x9b   :  { %v242_v34 = vsel %vm44_vm1, %v1114_v30, %v186_v28  ;;  %v207_v36 = vpop.permute.xlu1 %206 }
  0x9c   :  { %v250_v39 = vsel %vm243_vm2, %v242_v34, %v207_v36 }
  0x9e   :  { %v228_v41 = vpop.permute.xlu0 %227 }
  0x9f   :  { %v258_v30 = vsel %vm251_vm3, %v250_v39, %v228_v41 }
  0xc9   :  { %v132_v59 = vpop.f32.mrf.mxu0 }
  0xca   :  { %v259_v63 = vmul.f32 %v252_v60, %v132_v59 }
  0xcb   :  { %v718_v2 = vpop.f32.mrf.mxu0 }
  0xcc   :  { %828 = vmatmul.mubr.f32.vlgmr.msra.gmra.mxu1 %v259_v63 }
  0xcd   :  { %v137_v4 = vpop.f32.mrf.mxu0  ;;  %830 = vmatprep.mubr.msk.f32.mxu1 %vm854_vm0, %v853_v0 }
  0xce   :  { %v260_v7 = vmul.f32 %v253_v5, %v137_v4 }
  0xcf   :  { %v721_v9 = vpop.f32.mrf.mxu0 }
  0xd0   :  { %831 = vmatmul.mubr.f32.gmra.mxu1 %v260_v7 }
  0xd1   :  { %v142_v11 = vpop.f32.mrf.mxu0  ;;  %833 = vmatprep.mubr.msk.f32.mxu1 %vm854_vm0, %v853_v0 }
  0xd2   :  { %v261_v14 = vmul.f32 %v254_v12, %v142_v11 }
  0xd3   :  { %v724_v17 = vpop.f32.mrf.mxu0 }
  0xd4   :  { %834 = vmatmul.mubr.f32.gmra.mxu1 %v261_v14  ;;  %v370_v26 = vpop.f32.mrf.mxu1  ;;  %v651_v14 = vld [vmem:[%s1285_s6] ss:$0 sm:$0xff] }
  0xd5   :  { %v147_v18 = vpop.f32.mrf.mxu0  ;;  %836 = vmatprep.mubr.msk.f32.mxu1 %vm854_vm0, %v853_v0 }
  0xd6   :  { %v262_v22 = vmul.f32 %v255_v19, %v147_v18  ;;  %v747_v31 = vpop.f32.mrf.mxu1 }
  0xd7   :  { %v727_v25 = vpop.f32.mrf.mxu0 }
  0xd8   :  { %837 = vmatmul.mubr.f32.gmra.mxu1 %v262_v22 }
  0xd9   :  { %v152_v24 = vpop.f32.mrf.mxu0  ;;  %839 = vmatprep.mubr.msk.f32.mxu1 %vm854_vm0, %v853_v0 }
  0xda   :  { %v263_v33 = vmul.f32 %v256_v29, %v152_v24 }
  0xdb   :  { %v730_v35 = vpop.f32.mrf.mxu0  ;;  %v375_v27 = vpop.f32.mrf.mxu1 }
  0xdc   :  { %840 = vmatmul.mubr.f32.gmra.mxu1 %v263_v33 }
  0xdd   :  { %v157_v37 = vpop.f32.mrf.mxu0  ;;  %842 = vmatprep.mubr.msk.f32.mxu1 %vm854_vm0, %v853_v0  ;;  %v750_v42 = vpop.f32.mrf.mxu1 }
  0xde   :  { %v264_v40 = vmul.f32 %v257_v38, %v157_v37 }
  0xdf   :  { %v733_v43 = vpop.f32.mrf.mxu0  ;;  %v380_v44 = vpop.f32.mrf.mxu1 }
  0xe0   :  { %843 = vmatmul.mubr.f32.gmra.mxu1 %v264_v40 }
  0xe1   :  { %v162_v45 = vpop.f32.mrf.mxu0  ;;  %845 = vmatprep.mubr.msk.f32.mxu1 %vm854_vm0, %v853_v0  ;;  %v753_v47 = vpop.f32.mrf.mxu1 }
  0xe2   :  { %v265_v46 = vmul.f32 %v258_v30, %v162_v45 }
  0xe3   :  { %v736_v48 = vpop.f32.mrf.mxu0  ;;  %v385_v49 = vpop.f32.mrf.mxu1 }
  0xe4   :  { %846 = vmatmul.mubr.f32.gmra.mxu1 %v265_v46 }
  0xe5   :  { %v470_v50 = vpop.f32.mrf.mxu0  ;;  %v756_v52 = vpop.f32.mrf.mxu1 }
  0xe6   :  { %v471_v51 = vadd.f32 %v470_v50, %v370_v26 }
  0xe7   :  { %v776_v53 = vpop.f32.mrf.mxu0  ;;  %v390_v54 = vpop.f32.mrf.mxu1 }
  0xe8   :  { %v511_v15 = vadd.f32 %v651_v14, %v471_v51 }
  0xe9   :  { %v475_v55 = vpop.f32.mrf.mxu0  ;;  %v759_v57 = vpop.f32.mrf.mxu1 }
  0xea   :  { %v476_v56 = vadd.f32 %v475_v55, %v375_v27 }
  0xeb   :  { %v779_v58 = vpop.f32.mrf.mxu0 }
  0xec   :  { %v512_v19 = vadd.f32 %v651_v14, %v476_v56 }
  0xed   :  { %v480_v59 = vpop.f32.mrf.mxu0 }
  0xee   :  { %v481_v60 = vadd.f32 %v480_v59, %v380_v44 }
  0xef   :  { %v782_v61 = vpop.f32.mrf.mxu0  ;;  %v395_v62 = vpop.f32.mrf.mxu1 }
  0xf0   :  { %v513_v23 = vadd.f32 %v651_v14, %v481_v60 }
  0xf1   :  { %v485_v63 = vpop.f32.mrf.mxu0  ;;  %v762_v1 = vpop.f32.mrf.mxu1 }
  0xf2   :  { %v486_v0 = vadd.f32 %v485_v63, %v385_v49 }
  0xf3   :  { %v785_v2 = vpop.f32.mrf.mxu0  ;;  %v400_v3 = vpop.f32.mrf.mxu1 }
  0xf4   :  { %v514_v24 = vadd.f32 %v651_v14, %v486_v0 }
  0xf5   :  { %v490_v4 = vpop.f32.mrf.mxu0  ;;  %v765_v6 = vpop.f32.mrf.mxu1 }
  0xf6   :  { %v491_v5 = vadd.f32 %v490_v4, %v390_v54 }
  0xf7   :  { %v788_v7 = vpop.f32.mrf.mxu0 }
  0xf8   :  { %v515_v33 = vadd.f32 %v651_v14, %v491_v5 }
  0xf9   :  { %v495_v8 = vpop.f32.mrf.mxu0 }
  0xfa   :  { %v496_v9 = vadd.f32 %v495_v8, %v395_v62 }
  0xfb   :  { %v791_v10 = vpop.f32.mrf.mxu0 }
  0xfc   :  { %v516_v27 = vadd.f32 %v651_v14, %v496_v9 }
  0xfd   :  { %v500_v11 = vpop.f32.mrf.mxu0 }
  0xfe   :  { %v501_v12 = vadd.f32 %v500_v11, %v400_v3 }
  0xff   :  { %v794_v13 = vpop.f32.mrf.mxu0 }
 0x100   :  { %v517_v40 = vadd.f32 %v651_v14, %v501_v12 }
 0x18c   :  { %v584_v16 = vpop.f32.mrf.mxu1 }
 0x18d   :  { %v585_v17 = vadd.f32 %v584_v16, %v511_v15 }
 0x18e   :  { %v829_v18 = vpop.f32.mrf.mxu1 }
 0x18f   :  { %619 = vst.msk [vmem:[%s1286_s7] sm:$0xff] %vm618_vm4, %v585_v17 }
 0x190   :  { %v589_v20 = vpop.f32.mrf.mxu1 }
 0x191   :  { %v590_v21 = vadd.f32 %v589_v20, %v512_v19 }
 0x192   :  { %v832_v22 = vpop.f32.mrf.mxu1 }
 0x193   :  { %620 = vst.msk [vmem:[%s1286_s7 + $0x8] sm:$0xff] %vm618_vm4, %v590_v21 }
 0x194   :  { %v594_v25 = vpop.f32.mrf.mxu1 }
 0x195   :  { %v595_v26 = vadd.f32 %v594_v25, %v513_v23 }
 0x196   :  { %v835_v28 = vpop.f32.mrf.mxu1 }
 0x197   :  { %621 = vst.msk [vmem:[%s1286_s7 + $0x10] sm:$0xff] %vm618_vm4, %v595_v26 }
 0x198   :  { %v599_v29 = vpop.f32.mrf.mxu1 }
 0x199   :  { %v600_v31 = vadd.f32 %v599_v29, %v514_v24 }
 0x19a   :  { %v838_v32 = vpop.f32.mrf.mxu1 }
 0x19b   :  { %622 = vst.msk [vmem:[%s1286_s7 + $0x18] sm:$0xff] %vm618_vm4, %v600_v31 }
 0x19c   :  { %v604_v34 = vpop.f32.mrf.mxu1 }
 0x19d   :  { %v605_v35 = vadd.f32 %v604_v34, %v515_v33 }
 0x19e   :  { %v841_v36 = vpop.f32.mrf.mxu1 }
 0x19f   :  { %623 = vst.msk [vmem:[%s1286_s7 + $0x20] sm:$0xff] %vm618_vm4, %v605_v35 }
 0x1a0   :  { %v609_v37 = vpop.f32.mrf.mxu1 }
 0x1a1   :  { %v610_v38 = vadd.f32 %v609_v37, %v516_v27 }
 0x1a2   :  { %v844_v39 = vpop.f32.mrf.mxu1 }
 0x1a3   :  { %624 = vst.msk [vmem:[%s1286_s7 + $0x28] sm:$0xff] %vm618_vm4, %v610_v38 }
 0x1a4   :  { %v614_v41 = vpop.f32.mrf.mxu1 }
 0x1a5   :  { %v615_v42 = vadd.f32 %v614_v41, %v517_v40 }
 0x1a6   :  { %v847_v43 = vpop.f32.mrf.mxu1 }
 0x1a7   :  { %625 = vst.msk [vmem:[%s1286_s7 + $0x30] sm:$0xff] %vm618_vm4, %v615_v42 }

</bundles_post_ra>
